<compile_context>
chip_gen: v6e
topology: v6e:2x2x1
jax: 0.10.0
libtpu: 0.0.40
codegen_flags: <defaults>
</compile_context>

<pallas_src>
import math

import jax
import jax.numpy as jnp
from jax.experimental import pallas as pl
from jax.experimental.pallas import tpu as pltpu


def _lsv_add_kernel(x_ref, v_ref, o_ref):
    # x_ref: (tile_r, lane_w) activation tile
    # v_ref: (1, lane_w) steering vector in x.dtype (broadcast over sublanes)
    o_ref[...] = x_ref[...] + v_ref[...]


def _sublane_gran(itemsize):
    # f32 -> 8 rows/vreg, bf16/f16 -> 16, int8/fp8 -> 32.
    if itemsize >= 4:
        return 8
    if itemsize == 2:
        return 16
    return 32


def _pick_row_tile(rows, lane_w, itemsize, target_bytes=4 * 1024 * 1024):
    """Fixed near-target row tile; grid uses pl.cdiv so it need not divide rows."""
    gran = _sublane_gran(itemsize)
    if rows <= gran:
        # Tiny activations: a single full-extent block (equals array dim).
        return rows
    row_bytes = max(1, lane_w * itemsize)
    t = max(gran, (target_bytes // row_bytes) // gran * gran)
    # Guarantee >= 2 grid steps where possible so v7x's two TensorCores both
    # get work on this purely mem-bound kernel.
    half = ((rows + 1) // 2 + gran - 1) // gran * gran
    t = min(t, half)
    # Never exceed the (sublane-padded) array extent.
    t = min(t, (rows + gran - 1) // gran * gran)
    return t


def linear_combination_lsv_forward(x, lsv_matrix, linear_comb_matrix,
                                   lsv_index, lsv_scaling_factor,
                                   donate_x=False):
    """y = x + scaling * (linear_comb_matrix[lsv_index] @ lsv_matrix)."""
    B, T, C = x.shape

    # --- tiny O(N*C) reduction folded on the wrapper side, f32 accumulate ---
    # one_hot @ linear_comb_matrix == scaling * linear_comb_matrix[lsv_index]
    selected = lsv_scaling_factor * jnp.take(
        linear_comb_matrix.astype(jnp.float32), lsv_index, axis=0)       # (N,)
    combined = selected @ lsv_matrix.astype(jnp.float32)                 # (C,) f32

    # --- lane-dense 2D view: fold last dim up to lcm(C, 128) when possible ---
    total = B * T * C
    lane_w, rows, vec = C, B * T, combined
    if C % 128 != 0:
        fold_w = (C * 128) // math.gcd(C, 128)           # lcm(C, 128)
        if total % fold_w == 0:
            lane_w = fold_w
            rows = total // fold_w
            vec = jnp.tile(combined, fold_w // C)
        # else: fall back to lane_w = C (full-extent last dim is still legal,
        # just masked stores).
    x2d = x.reshape(rows, lane_w)
    vec2d = vec.astype(x.dtype).reshape(1, lane_w)        # add runs in x.dtype

    itemsize = jnp.dtype(x.dtype).itemsize
    tile_r = _pick_row_tile(rows, lane_w, itemsize)
    grid = (pl.cdiv(rows, tile_r),)

    # VMEM budget: in + out tiles, each double-buffered (~4x tile) + vec + slack.
    tile_bytes = tile_r * lane_w * itemsize
    vmem_limit = min(40 * 1024 * 1024,
                     max(16 * 1024 * 1024,
                         4 * tile_bytes + lane_w * itemsize + (1 << 20)))

    # Only alias when the caller actually donates x (e.g. jit donate_argnums);
    # otherwise XLA inserts a defensive full copy of x, doubling HBM traffic.
    aliases = {0: 0} if donate_x else {}

    out2d = pl.pallas_call(
        _lsv_add_kernel,
        out_shape=jax.ShapeDtypeStruct((rows, lane_w), x.dtype),
        grid=grid,
        in_specs=[
            pl.BlockSpec((tile_r, lane_w), lambda i: (i, 0)),
            pl.BlockSpec((1, lane_w), lambda i: (0, 0)),
        ],
        out_specs=pl.BlockSpec((tile_r, lane_w), lambda i: (i, 0)),
        input_output_aliases=aliases,
        compiler_params=pltpu.CompilerParams(
            dimension_semantics=("parallel",),
            vmem_limit_bytes=vmem_limit,
        ),
    )(x2d, vec2d)

    return out2d.reshape(B, T, C)


class LinearCombinationLSVJax:
    """JAX mirror of LinearCombinationLSV; forward dispatches to the kernel."""

    def __init__(self, lsv_dataset_num, n_embd, key=None, dtype=jnp.float32):
        self.lsv_index = 0
        self.lsv_dataset_num = lsv_dataset_num
        self.lsv_embd_dim = n_embd
        self.lsv_scaling_factor = 1.0
        self.mode = 1
        self.mixture = []
        if key is None:
            key = jax.random.PRNGKey(0)
        k1, k2 = jax.random.split(key)
        # torch.nn.init.normal_(std=0.02)
        self.lsv_matrix = 0.02 * jax.random.normal(
            k1, (lsv_dataset_num, n_embd), dtype)
        self.linear_comb_matrix = 0.02 * jax.random.normal(
            k2, (lsv_dataset_num, lsv_dataset_num), dtype)

    def update_lsv_scaling_factor(self, new_scaling_factor):
        self.lsv_scaling_factor = new_scaling_factor

    def get_lsv_scaling_factor(self):
        return self.lsv_scaling_factor

    def update_lsv_index(self, new_index):
        self.lsv_index = new_index

    def set_mixture(self, mixture_list):
        self.mixture = mixture_list

    def set_mode(self, mode):
        self.mode = mode

    # TODO(synk): freeze_non_selected_rows manipulates requires_grad (training-time
    # autograd masking); it has no forward-pass / Pallas equivalent and is omitted.
    def forward(self, x):
        return linear_combination_lsv_forward(
            x, self.lsv_matrix, self.linear_comb_matrix,
            self.lsv_index, self.lsv_scaling_factor)


if __name__ == "__main__":
    # Small shapes consistent with the module: batch=2, seq=8, n_embd=32, datasets=4
    B, T, C, N = 2, 8, 32, 4
    key = jax.random.PRNGKey(0)
    kx, kp = jax.random.split(key)
    x = jax.random.normal(kx, (B, T, C), dtype=jnp.float32)

    module = LinearCombinationLSVJax(lsv_dataset_num=N, n_embd=C, key=kp)
    module.update_lsv_index(1)
    module.update_lsv_scaling_factor(0.75)

    # Pure-JAX reference of the PyTorch forward (computed before the kernel call).
    one_hot = jnp.zeros((N,), jnp.float32).at[module.lsv_index].set(
        module.lsv_scaling_factor)
    combined_ref = (one_hot @ module.linear_comb_matrix.astype(jnp.float32)
                    ) @ module.lsv_matrix.astype(jnp.float32)
    expected = x + combined_ref

    y = jax.block_until_ready(module.forward(x))

    assert y.shape == x.shape and y.dtype == x.dtype
    assert bool(jnp.allclose(y, expected, rtol=1e-5, atol=1e-5)), \
        "LinearCombinationLSV forward mismatch vs reference"
    print("KERNEL_OK")
</pallas_src>

<mosaic_0001>
module attributes {stable_mosaic.version = 11 : i64} {
  func.func @_lsv_add_kernel(%arg0: i32, %arg1: memref<4x128xf32, #tpu.memory_space<vmem>>, %arg2: memref<1x128xf32, #tpu.memory_space<vmem>>, %arg3: memref<4x128xf32, #tpu.memory_space<vmem>>) attributes {dimension_semantics = [#tpu.dimension_semantics<parallel>], iteration_bounds = array<i64: 1>, scalar_prefetch = 0 : i64, scratch_operands = 0 : i64, tpu.core_type = #tpu.core_type<tc>, window_params = [{transform_indices = @transform_0, window_bounds = array<i64: 4, 128>}, {pipeline_mode = #tpu.pipeline_mode<synchronous>, transform_indices = @transform_1, window_bounds = array<i64: 1, 128>}, {transform_indices = @transform_2, window_bounds = array<i64: 4, 128>}]} {
    %c0 = arith.constant 0 : index
    %c0_0 = arith.constant 0 : index
    %0 = vector.load %arg1[%c0, %c0_0] : memref<4x128xf32, #tpu.memory_space<vmem>>, vector<4x128xf32>
    %c0_1 = arith.constant 0 : index
    %c0_2 = arith.constant 0 : index
    %1 = vector.load %arg2[%c0_1, %c0_2] : memref<1x128xf32, #tpu.memory_space<vmem>>, vector<1x128xf32>
    %2 = vector.broadcast %1 : vector<1x128xf32> to vector<4x128xf32>
    %3 = arith.addf %0, %2 : vector<4x128xf32>
    %c0_3 = arith.constant 0 : index
    %c0_4 = arith.constant 0 : index
    %4 = vector.load %arg3[%c0_3, %c0_4] : memref<4x128xf32, #tpu.memory_space<vmem>>, vector<4x128xf32>
    tpu.vector_store %arg3[%c0_3, %c0_4], %3 {strides = array<i32>} : memref<4x128xf32, #tpu.memory_space<vmem>>, vector<4x128xf32>,
    return
  }
  func.func @transform_0(%arg0: i32) -> (i32, i32) {
    %c0_i32 = arith.constant 0 : i32
    %c0_i32_0 = arith.constant 0 : i32
    return %arg0, %c0_i32 : i32, i32
  }
  func.func @transform_1(%arg0: i32) -> (i32, i32) {
    %c0_i32 = arith.constant 0 : i32
    %c0_i32_0 = arith.constant 0 : i32
    %c0_i32_1 = arith.constant 0 : i32
    return %c0_i32, %c0_i32_0 : i32, i32
  }
  func.func @transform_2(%arg0: i32) -> (i32, i32) {
    %c0_i32 = arith.constant 0 : i32
    %c0_i32_0 = arith.constant 0 : i32
    return %arg0, %c0_i32 : i32, i32
  }
}

</mosaic_0001>

<bundles_post_ra>
// kernel: tpu_custom_call.1
= control target key start
LH: loop header
LB: loop body
LE: loop exit
PB: predicated region body
PF: predicated region fallthrough
CT: control target
= control target key end

     0   :  { %7 = vsyncpa [#allocation3], 0  ;;  %s122_s0 = inlined_call_operand.hbm [shape: f32[4,128], index: 0, kind: input, shape index: {}]   ;;  %s123_s1 = inlined_call_operand.vmem [shape: f32[1,128], index: 1, kind: input, shape index: {}]   ;;  %s124_s2 = inlined_call_operand.hbm [shape: f32[4,128], index: 2, kind: output, shape index: {}]  }
   0x1   :  { %8 = vsyncpa [#allocation4], 0  ;;  %s96_s9 = smov [#allocation2]  }
   0x2   :  { %s15_s10 = sshll.u32 %s96_s9, 4  ;;  %s16_s10 = int_to_ptr.vmem [resolvable:$true] %s15_s10 }
   0x3   :  { %s60_s11 = scalar_lea.vmem %s16_s10, 64  ;;  %p65_p1 = scmp.lt.s32.totalorder %s16_s10, %s16_s10 }
   0x4   :  { %p61_p0 = scmp.ne.s32.totalorder %s16_s10, %s60_s11  ;;  %p66_p2 = scmp.lt.s32.totalorder %s60_s11, %s60_s11 }
   0x6   :  { %p67_p3 = por %p66_p2, %p65_p1 }
   0x8   :  { %p68_p4 = pnand %p67_p3, %p61_p0 }
   0xa   :  { %71 = shalt.err (!%p68_p4)
}
   0xb   :  { %18 = dma.hbm_to_vmem [thread:$0]  %s122_s0, 64, %s16_s10, [#allocation3]  }
   0xc   :  { %92 = dma.done.wait [#allocation3], 64  }
   0xd   :  { %93 = vsyncadd [#allocation3], 4294967232  ;;  %s97_s14 = smov [#allocation5]   ;;  %v24_v0 = vld [vmem:[#allocation2] sm:$0xf] }
   0xe   :  { %s40_s15 = sshll.u32 %s97_s14, 4  ;;  %v49_v1 = vld [vmem:[%s123_s1] ss:$0 sm:$0xff]  ;;  %s41_s15 = int_to_ptr.vmem [resolvable:$true] %s40_s15 }
   0xf   :  { %v32_v2 = vadd.f32 %v49_v1, %v24_v0  ;;  %s72_s18 = scalar_lea.vmem %s41_s15, 64  ;;  %p77_p6 = scmp.lt.s32.totalorder %s41_s15, %s41_s15 }
  0x10   :  { %p73_p5 = scmp.ne.s32.totalorder %s41_s15, %s72_s18  ;;  %p78_p7 = scmp.lt.s32.totalorder %s72_s18, %s72_s18 }
  0x11   :  { %33 = vst [vmem:[#allocation5] sm:$0xf] %v32_v2 }
  0x12   :  { %p79_p8 = por %p78_p7, %p77_p6 }
  0x14   :  { %p80_p9 = pnand %p79_p8, %p73_p5 }
  0x16   :  { %83 = shalt.err (!%p80_p9)
}
  0x17   :  { %43 = dma.vmem_to_hbm [thread:$0]  %s41_s15, 64, %s124_s2, [#allocation4]  }
  0x18   :  { %94 = dma.done.wait [#allocation4], 64  }
  0x19   :  { %95 = vsyncadd [#allocation4], 4294967232 }
  0x1a   :  { %47 = vsyncpa [#allocation3], 1 }
  0x1b   :  { %48 = vsyncpa [#allocation4], 1 }

</bundles_post_ra>
